<compile_context>
chip_gen: v7x
topology: tpu7x:2x2x1
jax: 0.10.0
libtpu: 0.0.40
codegen_flags: <defaults>
</compile_context>

<pallas_src>
import functools
import math

import jax
import jax.numpy as jnp
from jax.experimental import pallas as pl
from jax.experimental.pallas import tpu as pltpu


# ---------------------------------------------------------------------------
# tiling helpers
# ---------------------------------------------------------------------------

def _row_tile(n):
    for t in (512, 256, 128):
        if n > t:
            return t
    return n


def _lane_tile(n):
    for t in (2048, 1024, 512, 256, 128):
        if n % t == 0:
            return t
    return n


def _q_tile(kq):
    # Bound the (tq, lt) score/P intermediates (v7x has only 64 MiB VMEM).
    for t in (256, 128):
        if kq >= t:
            return t
    return kq


def _hw_tile(hw):
    # KV tile along the per-frame spatial axis; must divide HW exactly (softmax
    # correctness — no padded keys allowed).  Capped at 512 for v5e/v7x VMEM budgets.
    for t in (512, 256, 128):
        if hw % t == 0:
            return t
    return hw


# ---------------------------------------------------------------------------
# heatmap score kernel
# ---------------------------------------------------------------------------

def _score_kernel(h_ref, o_ref, *, eps):
    # h_ref: (Ch, t_hw), HW on lanes.  max over channels first (sigmoid is monotone,
    # so clip(sigmoid(max)) == max(clip(sigmoid))) — cuts EUP/VPU work by Ch.
    m = jnp.max(h_ref[...], axis=0, keepdims=True)                 # (1, t_hw)
    o_ref[...] = jnp.clip(jax.nn.sigmoid(m), eps, 1.0 - eps)


def heatmap_score_pallas(heat, eps=1e-4):
    """heat: (bs, Ch, HW) -> (bs, HW) of max_c clamp(sigmoid(heat))."""
    bs, Ch, HW = heat.shape
    t_hw = _lane_tile(HW)
    grid = (bs, HW // t_hw)
    out = pl.pallas_call(
        functools.partial(_score_kernel, eps=eps),
        out_shape=jax.ShapeDtypeStruct((bs, 1, HW), jnp.float32),
        grid=grid,
        in_specs=[pl.BlockSpec((None, Ch, t_hw), lambda b, j: (b, 0, j))],
        out_specs=pl.BlockSpec((None, 1, t_hw), lambda b, j: (b, 0, j)),
        compiler_params=pltpu.CompilerParams(
            dimension_semantics=("parallel", "parallel")),
    )(heat)
    return out.reshape(bs, HW)


# ---------------------------------------------------------------------------
# query MLP kernel (fc1 + GELU + fc2)
# ---------------------------------------------------------------------------

def _mlp_kernel(x_ref, w1_ref, b1_ref, w2_ref, b2_ref, o_ref):
    xb = x_ref[...].astype(jnp.bfloat16)
    h = jnp.dot(xb, w1_ref[...], preferred_element_type=jnp.float32) + b1_ref[...]
    # TODO(synk): PyTorch nn.GELU default is exact erf GELU; tanh approximation used here.
    h = jax.nn.gelu(h, approximate=True)
    o_ref[...] = (jnp.dot(h.astype(jnp.bfloat16), w2_ref[...],
                          preferred_element_type=jnp.float32)
                  + b2_ref[...]).astype(o_ref.dtype)


def query_mlp_pallas(x, w1, b1, w2, b2):
    """x: (N, Cq) f32 -> (N, E) f32; weights fed to the MXU in bf16."""
    N, Cq = x.shape
    H = w1.shape[1]
    M = w2.shape[1]
    tm = _row_tile(N)
    grid = (pl.cdiv(N, tm),)
    return pl.pallas_call(
        _mlp_kernel,
        out_shape=jax.ShapeDtypeStruct((N, M), jnp.float32),
        grid=grid,
        in_specs=[
            pl.BlockSpec((tm, Cq), lambda i: (i, 0)),
            pl.BlockSpec((Cq, H), lambda i: (0, 0)),
            pl.BlockSpec((1, H), lambda i: (0, 0)),
            pl.BlockSpec((H, M), lambda i: (0, 0)),
            pl.BlockSpec((1, M), lambda i: (0, 0)),
        ],
        out_specs=pl.BlockSpec((tm, M), lambda i: (i, 0)),
        compiler_params=pltpu.CompilerParams(dimension_semantics=("parallel",)),
    )(x, w1.astype(jnp.bfloat16), b1.reshape(1, H),
      w2.astype(jnp.bfloat16), b2.reshape(1, M))


# ---------------------------------------------------------------------------
# fused per-layer kernel:
#   Q proj  ->  (in-VMEM K/V proj + online-softmax flash attention over frames x HW tiles)
#          ->  out proj + residual + LN1 + FFN + residual + LN2
# ---------------------------------------------------------------------------

def _layer_kernel(q_ref, qpos_ref, x_ref, t_ref,
                  wq_ref, bq_ref, wkv_ref, bv_ref, wo_ref, bo_ref,
                  ln1g_ref, ln1b_ref, fw1_ref, fb1_ref, fw2_ref, fb2_ref,
                  ln2g_ref, ln2b_ref, o_ref,
                  q_sc, m_sc, l_sc, acc_sc,
                  *, num_heads, scale, ln_eps):
    f_idx = pl.program_id(2)
    j_idx = pl.program_id(3)

    # ---------------- prologue: Q projection (scale folded in) + stats init ----------
    @pl.when(jnp.logical_and(f_idx == 0, j_idx == 0))
    def _():
        qi = (q_ref[...] + qpos_ref[...]).astype(jnp.bfloat16)          # (tq, E)
        for h in range(num_heads):                                      # leading-dim index, no lane slices
            qh = jax.lax.dot_general(qi, wq_ref[h], (((1,), (0,)), ((), ())),
                                     preferred_element_type=jnp.float32)  # (tq, dh)
            q_sc[h] = ((qh + bq_ref[h]) * scale).astype(jnp.bfloat16)
        m_sc[...] = jnp.full(m_sc.shape, -jnp.inf, dtype=jnp.float32)
        l_sc[...] = jnp.zeros(l_sc.shape, dtype=jnp.float32)
        acc_sc[...] = jnp.zeros(acc_sc.shape, dtype=jnp.float32)

    # ---------------- K/V projection of this tile (in VMEM, head-major, lane-dense) --
    # xt: channel-major (E, lt); `value + time_pos` of the reference done in-kernel.
    xt = (x_ref[...] + t_ref[...]).astype(jnp.bfloat16)                  # (E, lt)
    kv = jax.lax.dot_general(wkv_ref[...], xt, (((2,), (0,)), ((), ())),
                             preferred_element_type=jnp.float32)         # (2H, dh, lt)
    kv = kv.astype(jnp.bfloat16)
    # NOTE: the K-projection bias is dropped — it adds q·bk to every key score equally,
    # and softmax is invariant to a per-query constant shift (exact).  The V-projection
    # bias is applied once in the epilogue (attention weights sum to 1).

    # ---------------- online-softmax accumulation over this KV tile ------------------
    for h in range(num_heads):
        k_h = kv[h]                                                      # (dh, lt)
        v_h = kv[num_heads + h]                                          # (dh, lt)
        s = jax.lax.dot_general(q_sc[h], k_h, (((1,), (0,)), ((), ())),
                                preferred_element_type=jnp.float32)      # (tq, lt)
        m_prev = m_sc[h]                                                 # (tq, 1)
        m_new = jnp.maximum(m_prev, jnp.max(s, axis=-1, keepdims=True))
        alpha = jnp.exp(m_prev - m_new)
        p = jnp.exp(s - m_new)
        l_sc[h] = alpha * l_sc[h] + jnp.sum(p, axis=-1, keepdims=True)
        acc_sc[h] = alpha * acc_sc[h] + jax.lax.dot_general(
            p.astype(jnp.bfloat16), v_h, (((1,), (1,)), ((), ())),
            preferred_element_type=jnp.float32)                          # (tq, dh)
        m_sc[h] = m_new

    # ---------------- epilogue: out proj + residual + LN1 + FFN + LN2 ---------------
    last = jnp.logical_and(f_idx == pl.num_programs(2) - 1,
                           j_idx == pl.num_programs(3) - 1)

    @pl.when(last)
    def _():
        y = None
        for h in range(num_heads):
            inv = pl.reciprocal(l_sc[h], approx=True)                    # (tq, 1) via EUP
            attn_h = (acc_sc[h] * inv + bv_ref[h]).astype(jnp.bfloat16)  # (tq, dh)
            c = jax.lax.dot_general(attn_h, wo_ref[h], (((1,), (0,)), ((), ())),
                                    preferred_element_type=jnp.float32)  # (tq, E)
            y = c if y is None else y + c
        z = q_ref[...] + y + bo_ref[...]                                 # residual (dropout omitted)
        mu = jnp.mean(z, axis=-1, keepdims=True)
        var = jnp.mean((z - mu) ** 2, axis=-1, keepdims=True)
        x1 = (z - mu) * jax.lax.rsqrt(var + ln_eps) * ln1g_ref[...] + ln1b_ref[...]

        h1 = jnp.maximum(
            jax.lax.dot_general(x1.astype(jnp.bfloat16), fw1_ref[...],
                                (((1,), (0,)), ((), ())),
                                preferred_element_type=jnp.float32) + fb1_ref[...], 0.0)
        y2 = jax.lax.dot_general(h1.astype(jnp.bfloat16), fw2_ref[...],
                                 (((1,), (0,)), ((), ())),
                                 preferred_element_type=jnp.float32) + fb2_ref[...]
        z2 = x1 + y2
        mu2 = jnp.mean(z2, axis=-1, keepdims=True)
        var2 = jnp.mean((z2 - mu2) ** 2, axis=-1, keepdims=True)
        o_ref[...] = ((z2 - mu2) * jax.lax.rsqrt(var2 + ln_eps)
                      * ln2g_ref[...] + ln2b_ref[...]).astype(o_ref.dtype)


def attn_ffn_layer_pallas(query, query_pos, x_cm, t_emb, w, num_heads, ln_eps=1e-5):
    """One TemporalCrossAttentionLayer (attn + add&norm + FFN + add&norm) in one kernel.

    query/query_pos: (bs, kq, E) f32; x_cm: (bs, frames, E, HW) bf16 channel-major;
    t_emb: (frames, E, 1) f32; w: head-major / bf16 layer weights.
    """
    bs, kq, E = query.shape
    _, frames, _, HW = x_cm.shape
    assert E % num_heads == 0
    dh = E // num_heads
    F = w["fw1"].shape[1]
    scale = 1.0 / math.sqrt(dh)
    tq = _q_tile(kq)
    lt = _hw_tile(HW)
    grid = (bs, pl.cdiv(kq, tq), frames, HW // lt)

    kernel = functools.partial(_layer_kernel, num_heads=num_heads,
                               scale=scale, ln_eps=ln_eps)
    return pl.pallas_call(
        kernel,
        out_shape=jax.ShapeDtypeStruct((bs, kq, E), jnp.float32),
        grid=grid,
        in_specs=[
            pl.BlockSpec((None, tq, E), lambda b, q, f, j: (b, q, 0)),          # query (residual)
            pl.BlockSpec((None, tq, E), lambda b, q, f, j: (b, q, 0)),          # query_pos
            pl.BlockSpec((None, None, E, lt), lambda b, q, f, j: (b, f, 0, j)),  # BEV value tile (bf16)
            pl.BlockSpec((None, E, 1), lambda b, q, f, j: (f, 0, 0)),            # time embedding (per frame)
            pl.BlockSpec((num_heads, E, dh), lambda b, q, f, j: (0, 0, 0)),      # wq head-major (bf16)
            pl.BlockSpec((num_heads, 1, dh), lambda b, q, f, j: (0, 0, 0)),      # bq head-major
            pl.BlockSpec((2 * num_heads, dh, E), lambda b, q, f, j: (0, 0, 0)),  # wk|wv head-major (bf16)
            pl.BlockSpec((num_heads, 1, dh), lambda b, q, f, j: (0, 0, 0)),      # bv head-major
            pl.BlockSpec((num_heads, dh, E), lambda b, q, f, j: (0, 0, 0)),      # wo head-major (bf16)
            pl.BlockSpec((1, E), lambda b, q, f, j: (0, 0)),                     # bo
            pl.BlockSpec((1, E), lambda b, q, f, j: (0, 0)),                     # ln1 gamma
            pl.BlockSpec((1, E), lambda b, q, f, j: (0, 0)),                     # ln1 beta
            pl.BlockSpec((E, F), lambda b, q, f, j: (0, 0)),                     # ffn w1 (bf16)
            pl.BlockSpec((1, F), lambda b, q, f, j: (0, 0)),                     # ffn b1
            pl.BlockSpec((F, E), lambda b, q, f, j: (0, 0)),                     # ffn w2 (bf16)
            pl.BlockSpec((1, E), lambda b, q, f, j: (0, 0)),                     # ffn b2
            pl.BlockSpec((1, E), lambda b, q, f, j: (0, 0)),                     # ln2 gamma
            pl.BlockSpec((1, E), lambda b, q, f, j: (0, 0)),                     # ln2 beta
        ],
        out_specs=pl.BlockSpec((None, tq, E), lambda b, q, f, j: (b, q, 0)),
        scratch_shapes=[
            pltpu.VMEM((num_heads, tq, dh), jnp.bfloat16),   # projected, pre-scaled Q
            pltpu.VMEM((num_heads, tq, 1), jnp.float32),     # running max
            pltpu.VMEM((num_heads, tq, 1), jnp.float32),     # running denom
            pltpu.VMEM((num_heads, tq, dh), jnp.float32),    # running output
        ],
        compiler_params=pltpu.CompilerParams(
            dimension_semantics=("parallel", "parallel", "arbitrary", "arbitrary"),
            vmem_limit_bytes=32 * 1024 * 1024),
    )(query, query_pos, x_cm, t_emb, w["wq"], w["bq"], w["wkv"], w["bv"],
      w["wo"], w["bo"], w["ln1_g"], w["ln1_b"],
      w["fw1"], w["fb1"], w["fw2"], w["fb2"], w["ln2_g"], w["ln2_b"])


def _prep_layer(lp, num_heads):
    """Rearrange canonical (E,E)/(E,F) weights into head-major bf16 operands (tiny, host/XLA side)."""
    E = lp["wq"].shape[0]
    dh = E // num_heads
    bf = jnp.bfloat16
    wq_hm = jnp.transpose(lp["wq"].reshape(E, num_heads, dh), (1, 0, 2)).astype(bf)   # (H, E, dh)
    bq_hm = lp["bq"].reshape(num_heads, 1, dh)
    wk_hm = jnp.transpose(lp["wk"]).reshape(num_heads, dh, E)
    wv_hm = jnp.transpose(lp["wv"]).reshape(num_heads, dh, E)
    wkv_hm = jnp.concatenate([wk_hm, wv_hm], axis=0).astype(bf)                        # (2H, dh, E)
    bv_hm = lp["bv"].reshape(num_heads, 1, dh)
    wo_hm = lp["wo"].reshape(num_heads, dh, E).astype(bf)                              # (H, dh, E)
    F = lp["ffn_w1"].shape[1]
    return dict(
        wq=wq_hm, bq=bq_hm, wkv=wkv_hm, bv=bv_hm, wo=wo_hm,
        bo=lp["bo"].reshape(1, E),
        ln1_g=lp["ln1_g"].reshape(1, E), ln1_b=lp["ln1_b"].reshape(1, E),
        fw1=lp["ffn_w1"].astype(bf), fb1=lp["ffn_b1"].reshape(1, F),
        fw2=lp["ffn_w2"].astype(bf), fb2=lp["ffn_b2"].reshape(1, E),
        ln2_g=lp["ln2_g"].reshape(1, E), ln2_b=lp["ln2_b"].reshape(1, E),
    )


# ---------------------------------------------------------------------------
# plain-JAX glue
# ---------------------------------------------------------------------------

def sine_positional_encoding(bs, H, W, embed_dims,
                             temperature=10000.0, scale=2.0 * math.pi, eps=1e-6):
    """SinePositionalEncoding(num_feats=embed_dims//2, normalize=True), all-valid mask.
    Input-independent -> computed once and passed in."""
    num_feats = embed_dims // 2
    not_mask = jnp.ones((bs, H, W), jnp.float32)
    y_embed = jnp.cumsum(not_mask, axis=1)
    x_embed = jnp.cumsum(not_mask, axis=2)
    y_embed = y_embed / (y_embed[:, -1:, :] + eps) * scale
    x_embed = x_embed / (x_embed[:, :, -1:] + eps) * scale
    dim_t = jnp.arange(num_feats, dtype=jnp.float32)
    dim_t = temperature ** (2.0 * jnp.floor(dim_t / 2.0) / num_feats)
    pos_x = x_embed[..., None] / dim_t
    pos_y = y_embed[..., None] / dim_t
    pos_x = jnp.stack([jnp.sin(pos_x[..., 0::2]), jnp.cos(pos_x[..., 1::2])],
                      axis=4).reshape(bs, H, W, -1)
    pos_y = jnp.stack([jnp.sin(pos_y[..., 0::2]), jnp.cos(pos_y[..., 1::2])],
                      axis=4).reshape(bs, H, W, -1)
    pos = jnp.concatenate([pos_y, pos_x], axis=3)
    return pos.reshape(bs, H * W, embed_dims)


TASKS = ["reg", "height", "dim", "rot", "vel", "heatmap"]


def preds2query(params, preds, bs, HW, k, eps=1e-4):
    query_feats, heatmaps = [], []
    for pred in preds:
        d = pred[0]
        for task in TASKS:
            if task == "heatmap":
                heatmaps.append(d[task])
            query_feats.append(d[task])

    heat = jnp.concatenate(heatmaps, axis=1)                  # (bs, Ch, H, W)
    heat = heat.reshape(bs, heat.shape[1], HW)
    scores = heatmap_score_pallas(heat, eps=eps)              # (bs, HW)
    _, mask_ind = jax.lax.top_k(scores, k)                    # (bs, k) — plain-JAX top-k

    query_all = jnp.concatenate(query_feats, axis=1)          # (bs, 70, H, W)
    Cq = query_all.shape[1]
    q_flat = query_all.reshape(bs, Cq, HW)
    q_sel = jnp.take_along_axis(q_flat, mask_ind[:, None, :], axis=2)   # (bs, Cq, k)
    query = jnp.transpose(q_sel, (0, 2, 1)).reshape(bs * k, Cq)

    q_emb = query_mlp_pallas(query, params["mlp_w1"], params["mlp_b1"],
                             params["mlp_w2"], params["mlp_b2"])
    E = params["mlp_w2"].shape[1]
    return q_emb.reshape(bs, k, E), mask_ind


def temporal_fusion_forward(params, x, preds, pos_flat, *, num_heads, k):
    bs, frames, ch, bevx, bevy = x.shape
    HW = bevx * bevy
    E = ch

    query, mask_ind = preds2query(params, preds, bs, HW, k)

    # Channel-major BEV features reused directly (HW already minor -> no transpose),
    # cast once to bf16 for the in-kernel K/V projection (halves HBM reads per layer).
    x_cm = x.reshape(bs, frames, ch, HW).astype(jnp.bfloat16)
    t_emb = params["time_embed"].reshape(frames, E, 1)

    # query positional encoding gathered at the selected BEV locations (pos precomputed)
    query_pos = jnp.take_along_axis(pos_flat, mask_ind[:, :, None], axis=1)  # (bs, k, E)

    # TODO(synk): TemporalDeformableAttention's MSDeformAttn sampling (grid_sample /
    # im2col over spatial_shapes) has no reference here; approximated by dense
    # temporal cross-attention layers over the full (frames*H*W) value sequence.
    out = query
    for lp in params["layers"]:
        w = _prep_layer(lp, num_heads)
        out = attn_ffn_layer_pallas(out, query_pos, x_cm, t_emb, w, num_heads)

    # scatter selected tokens back into the dense BEV grid
    out_fill = jnp.zeros((bs, HW, ch), jnp.float32)
    bidx = jnp.arange(bs)[:, None]
    out_fill = out_fill.at[bidx, mask_ind].set(out)
    out_fill = jnp.transpose(out_fill, (0, 2, 1)).reshape(bs, ch, bevx, bevy)
    return out_fill


# ---------------------------------------------------------------------------
# deterministic parameter / input construction
# ---------------------------------------------------------------------------

def init_params(key, embed_dims, num_levels, num_layers, ffn_dim, query_in=70):
    def dense(kk, fan_in, fan_out):
        w = jax.random.normal(kk, (fan_in, fan_out), jnp.float32) / math.sqrt(fan_in)
        b = jnp.zeros((fan_out,), jnp.float32)
        return w, b

    keys = jax.random.split(key, 3 + num_layers)
    params = {}
    params["mlp_w1"], params["mlp_b1"] = dense(keys[0], query_in, embed_dims)
    params["mlp_w2"], params["mlp_b2"] = dense(keys[1], embed_dims, embed_dims)
    params["time_embed"] = jax.random.normal(keys[2], (num_levels, embed_dims), jnp.float32)

    layers = []
    for li in range(num_layers):
        lk = jax.random.split(keys[3 + li], 6)
        lp = {}
        lp["wq"], lp["bq"] = dense(lk[0], embed_dims, embed_dims)
        lp["wk"], lp["bk"] = dense(lk[1], embed_dims, embed_dims)
        lp["wv"], lp["bv"] = dense(lk[2], embed_dims, embed_dims)
        lp["wo"], lp["bo"] = dense(lk[3], embed_dims, embed_dims)
        lp["ffn_w1"], lp["ffn_b1"] = dense(lk[4], embed_dims, ffn_dim)
        lp["ffn_w2"], lp["ffn_b2"] = dense(lk[5], ffn_dim, embed_dims)
        lp["ln1_g"] = jnp.ones((embed_dims,), jnp.float32)
        lp["ln1_b"] = jnp.zeros((embed_dims,), jnp.float32)
        lp["ln2_g"] = jnp.ones((embed_dims,), jnp.float32)
        lp["ln2_b"] = jnp.zeros((embed_dims,), jnp.float32)
        layers.append(lp)
    params["layers"] = layers
    return params


def make_preds(key, bs, bevx, bevy):
    """6 CenterPoint-style task heads; total concatenated channels = 6*10 + 10 = 70."""
    reg_specs = {"reg": 2, "height": 1, "dim": 3, "rot": 2, "vel": 2}
    heat_classes = [1, 2, 2, 1, 2, 2]
    preds = []
    for nc in heat_classes:
        d = {}
        for task, c in reg_specs.items():
            key, sub = jax.random.split(key)
            d[task] = jax.random.normal(sub, (bs, c, bevx, bevy), jnp.float32)
        key, sub = jax.random.split(key)
        d["heatmap"] = jax.random.normal(sub, (bs, nc, bevx, bevy), jnp.float32)
        preds.append([d])
    return preds


if __name__ == "__main__":
    bs, frames, ch, bevx, bevy = 2, 2, 32, 16, 16
    embed_dims = ch
    num_heads = 4
    num_levels = frames
    num_layers = 2
    ffn_dim = 64
    # Original module hard-codes k=1024 (needs bevx*bevy >= 1024); scaled for the small test.
    k = 128

    key = jax.random.PRNGKey(0)
    key, kx, kp, kparam = jax.random.split(key, 4)
    x = jax.random.normal(kx, (bs, frames, ch, bevx, bevy), jnp.float32)
    preds = make_preds(kp, bs, bevx, bevy)
    params = init_params(kparam, embed_dims, num_levels, num_layers, ffn_dim)

    # hoisted, input-independent positional encoding (computed once, passed in)
    pos_flat = sine_positional_encoding(bs, bevx, bevy, embed_dims)

    out = temporal_fusion_forward(params, x, preds, pos_flat, num_heads=num_heads, k=k)
    out = jax.block_until_ready(out)
    assert out.shape == (bs, ch, bevx, bevy), out.shape
    assert bool(jnp.all(jnp.isfinite(out)))
    print("KERNEL_OK")
</pallas_src>

<mosaic_0001>
module attributes {stable_mosaic.version = 11 : i64} {
  func.func @_score_kernel(%arg0: i32, %arg1: i32, %arg2: memref<1x10x256xf32, #tpu.memory_space<vmem>>, %arg3: memref<1x1x256xf32, #tpu.memory_space<vmem>>) attributes {dimension_semantics = [#tpu.dimension_semantics<parallel>, #tpu.dimension_semantics<parallel>], iteration_bounds = array<i64: 2, 1>, scalar_prefetch = 0 : i64, scratch_operands = 0 : i64, tpu.core_type = #tpu.core_type<tc>, window_params = [{transform_indices = @transform_0, window_bounds = array<i64: 1, 10, 256>}, {transform_indices = @transform_1, window_bounds = array<i64: 1, 1, 256>}]} {
    %c0 = arith.constant 0 : index
    %c0_0 = arith.constant 0 : index
    %c0_1 = arith.constant 0 : index
    %0 = vector.load %arg2[%c0, %c0_0, %c0_1] : memref<1x10x256xf32, #tpu.memory_space<vmem>>, vector<1x10x256xf32>
    %1 = vector.shape_cast %0 : vector<1x10x256xf32> to vector<10x256xf32>
    %cst = arith.constant dense<0xFF800000> : vector<256xf32>
    %2 = vector.multi_reduction <maximumf>, %1, %cst [0] : vector<10x256xf32> to vector<256xf32>
    %3 = vector.shape_cast %2 : vector<256xf32> to vector<1x256xf32>
    %4 = arith.negf %3 : vector<1x256xf32>
    %5 = math.exp %4 : vector<1x256xf32>
    %cst_2 = arith.constant 1.000000e+00 : f32
    %6 = vector.broadcast %cst_2 : f32 to vector<1x256xf32>
    %7 = arith.addf %6, %5 : vector<1x256xf32>
    %8 = arith.divf %6, %7 : vector<1x256xf32>
    %cst_3 = arith.constant 9.99999974E-5 : f32
    %cst_4 = arith.constant 0.999899983 : f32
    %9 = vector.broadcast %cst_3 : f32 to vector<1x256xf32>
    %10 = arith.maximumf %9, %8 : vector<1x256xf32>
    %11 = vector.broadcast %cst_4 : f32 to vector<1x256xf32>
    %12 = arith.minimumf %11, %10 : vector<1x256xf32>
    %c0_5 = arith.constant 0 : index
    %c0_6 = arith.constant 0 : index
    %c0_7 = arith.constant 0 : index
    %13 = vector.load %arg3[%c0_5, %c0_6, %c0_7] : memref<1x1x256xf32, #tpu.memory_space<vmem>>, vector<1x1x256xf32>
    %14 = vector.shape_cast %13 : vector<1x1x256xf32> to vector<1x256xf32>
    %15 = vector.shape_cast %12 : vector<1x256xf32> to vector<1x1x256xf32>
    tpu.vector_store %arg3[%c0_5, %c0_6, %c0_7], %15 {strides = array<i32>} : memref<1x1x256xf32, #tpu.memory_space<vmem>>, vector<1x1x256xf32>,
    return
  }
  func.func @transform_0(%arg0: i32, %arg1: i32) -> (i32, i32, i32) {
    %c0_i32 = arith.constant 0 : i32
    %c0_i32_0 = arith.constant 0 : i32
    return %arg0, %c0_i32, %arg1 : i32, i32, i32
  }
  func.func @transform_1(%arg0: i32, %arg1: i32) -> (i32, i32, i32) {
    %c0_i32 = arith.constant 0 : i32
    %c0_i32_0 = arith.constant 0 : i32
    return %arg0, %c0_i32, %arg1 : i32, i32, i32
  }
}

</mosaic_0001>

<bundles_post_ra>
// kernel: tpu_custom_call.1
= control target key start
LH: loop header
LB: loop body
LE: loop exit
PB: predicated region body
PF: predicated region fallthrough
CT: control target
= control target key end

     0   :  { %6 = vsyncpa [#allocation3], 0  ;;  %s584_s0 = inlined_call_operand.vmem [shape: f32[2,10,256], index: 0, kind: input, shape index: {}]   ;;  %s585_s1 = inlined_call_operand.hbm [shape: f32[2,1,256], index: 1, kind: output, shape index: {}]  }
   0x1   :  { %8 = vsyncpa [#allocation3 + $0x1], 0  ;;  %s472_s6 = smov 0   ;;  %s474_s7 = smov 0  }
   0x2   :  { %s476_s8 = smov 0   ;;  %s478_s9 = smov 0  }
   0x3   :  { %s480_s10 = smov 0   ;;  %s482_s11 = smov 0  }
   0x4 LB: > { %s299_s12 = sadd.s32 4294967295, %s458_s11   ;;  %s300_s13 = sadd.s32 4294967294, %s458_s11   ;;  %s458_s11 = sphi %s482_s11, %s14_s11   ;;  %s454_s10 = sphi %s480_s10, %s592_s10   ;;  %s450_s9 = sphi %s478_s9, %s591_s9   ;;  %s446_s8 = sphi %s476_s8, %s590_s8   ;;  %s442_s7 = sphi %s474_s7, %s589_s7   ;;  %s438_s6 = sphi %s472_s6, %s588_s6  }
   0x5   : > { %s26_s14 = sadd.s32 1, %s454_s10  ;;  %s63_s15 = sadd.s32 1, %s446_s8 }
   0x6   : > { %p28_p0 = scmp.ge.s32.totalorder %s26_s14, 2  ;;  %p73_p1 = scmp.ne.s32.totalorder %s446_s8, %s442_s7 }
   0x7   : > { %p74_p2 = scmp.eq.s32.totalorder %s299_s12, 1  ;;  %p79_p3 = scmp.ne.s32.totalorder %s442_s7, %s438_s6 }
   0x8   : > { %s594_s14 = smov (%p28_p0, %s26_s14), 0  ;;  %p80_p5 = scmp.eq.s32.totalorder %s300_s13, 1 }
   0x9   : > { %p512_p4 = por %p74_p2, %p73_p1  ;;  %s58_s17 = ssub.s32 %s454_s10, %s594_s14 }
   0xa   : > { %p303_p6 = scmp.ge.s32.totalorder %s458_s11, 1  ;;  %p61_p7 = scmp.eq.s32.totalorder %s58_s17, 0 }
   0xb   : > { %p519_p8 = por %p80_p5, %p79_p3  ;;  %p111_p9 = scmp.lt.s32.totalorder %s458_s11, 3 }
   0xc   : > { %s525_s19 = scalar_select %p61_p7, %s446_s8, %s63_s15  }
   0xd   : > { %p112_p10 = pnand %p303_p6, %p111_p9 }
   0xe   : > { %p136_p11 = scmp.lt.s32.totalorder (!%p112_p10), %s450_s9, 1  ;;  %vm150_vm0 = vcmask (!%p112_p10), 1041408   ;;  %v460_v26 = vmov (!%p112_p10), 1966171168   ;;  %v189_v28 = vlaneseq (!%p112_p10)  ;;  %s132_s25 = sand.u32 (!%p112_p10), 1, %s442_s7  }
   0xf   : > { %115 = sbr.rel (%p112_p10) target bundleno = 93 (0x5d), region = 24  ;;  %v187_v27 = vunpack.c.l.s4 (!%p112_p10), %v460_v26  ;;  %s304_s26 = sshll.u32 (!%p112_p10), %s132_s25, 1 }
  0x10   : > { %v190_v31 = vshrl.u32 (!%p112_p10), %v189_v28, 7  ;;  %s134_s27 = scalar_lea.vmem (!%p112_p10), [#allocation2], %s304_s26  ;;  %s315_s29 = sshll.u32 (!%p112_p10), %s450_s9, 5  ;;  %vm203_vm1 = vcmp.lt.s32.totalorder (!%p112_p10), %v189_v28, 256 }
  0x11   : > { %v188_v30 = vunpack.c.0.s8 (!%p112_p10), %v187_v27  ;;  %s223_s28 = sshll.u32 (!%p112_p10), %s134_s27, 4  ;;  %s539_s3 = scalar_lea.hbm (!%p112_p10), %s585_s1, %s315_s29  ;;  %s534_s28 = int_to_ptr.vmem [resolvable:$true] %s223_s28 }
  0x12   : > { %s207_s4 = scalar_lea.sflag (!%p112_p10), [#allocation3], %s132_s25  ;;  %s380_s5 = scalar_lea.vmem (!%p112_p10), %s534_s28, 32 }
  0x13   : > { %v191_v37 = vsub.s32 (!%p112_p10), %v188_v30, %v190_v31  ;;  %p381_p12 = scmp.ne.s32.totalorder (!%p112_p10), %s534_s28, %s380_s5 }
  0x15   : > { %p382_p13 = pnand (!%p112_p10), %p381_p12, %p512_p4 }
  0x16   : > { %s137_s20 = scalar_select %p136_p11, %s450_s9, 1 }
  0x17   : > { %p383_p0 = pneg %p382_p13  ;;  %s461_s9 = smov [#allocation2]  }
  0x18   : > { %s314_s21 = sshll.u32 %s137_s20, 5  ;;  %s384_s12 = sshll.u32 %s461_s9, 4  ;;  %s385_s12 = int_to_ptr.vmem [resolvable:$false] %s384_s12 }
  0x19   : > { %s143_s24 = scalar_lea.vmem %s584_s0, %s314_s21  ;;  %s386_s13 = scalar_lea.vmem %s385_s12, 64 }
  0x1a   : > { %v146_v0 = vld [vmem:[%s143_s24] sm:$0xff]  ;;  %v147_v1 = vld [vmem:[%s143_s24 + $0x8] sm:$0xff]  ;;  %v148_v2 = vld [vmem:[%s143_s24 + $0x10] sm:$0x3]  ;;  %p387_p1 = scmp.lt.s32.totalorder %s534_s28, %s385_s12  ;;  %p388_p2 = scmp.lt.s32.totalorder %s386_s13, %s380_s5 }
  0x1b   : > { %v149_v3 = vld [vmem:[%s143_s24 + $0x18] sm:$0x3]  ;;  %v151_v4 = vsel %vm150_vm0, %v148_v2, -inf }
  0x1c   : > { %v152_v5 = vmax.f32 %v146_v0, %v151_v4  ;;  %v159_v6 = vsel %vm150_vm0, %v149_v3, -inf  ;;  %p389_p3 = por %p388_p2, %p387_p1 }
  0x1d   : > { %v160_v7 = vmax.f32 %v147_v1, %v159_v6 }
  0x1e   : > { %v153_v8 = vrot.slane %v152_v5, 4  ;;  %p390_p5 = pnand %p389_p3, %p383_p0 }
  0x1f   : > { %v161_v9 = vrot.slane %v160_v7, 4 }
  0x20   : > { %v154_v10 = vmax.f32 %v152_v5, %v153_v8 }
  0x21   : > { %v162_v11 = vmax.f32 %v160_v7, %v161_v9 }
  0x22   : > { %v155_v12 = vrot.slane %v154_v10, 2 }
  0x23   : > { %v163_v13 = vrot.slane %v162_v11, 2 }
  0x24   : > { %v156_v14 = vmax.f32 %v154_v10, %v155_v12 }
  0x25   : > { %v164_v15 = vmax.f32 %v162_v11, %v163_v13 }
  0x26   : > { %v157_v16 = vrot.slane %v156_v14, 1 }
  0x27   : > { %v165_v17 = vrot.slane %v164_v15, 1 }
  0x28   : > { %v158_v18 = vmax.f32 %v156_v14, %v157_v16 }
  0x29   : > { %v166_v19 = vmax.f32 %v164_v15, %v165_v17 }
  0x2a   : > { %v307_v20 = vmul.f32 -1.442695, %v158_v18 }
  0x2b   : > { %v308_v21 = vmul.f32 -1.442695, %v166_v19 }
  0x2c   : > { %372 = vpow2.f32 %v307_v20 }
  0x2d   : > { %374 = vpow2.f32 %v308_v21 }
  0x36   : > { %v373_v22 = vpop.eup %372 }
  0x37   : > { %v375_v23 = vpop.eup %374  ;;  %v173_v24 = vadd.f32 1.0, %v373_v22 }
  0x38   : > { %v174_v25 = vadd.f32 1.0, %v375_v23 }
  0x39   : > { %376 = vrcp.f32 %v173_v24 }
  0x3a   : > { %378 = vrcp.f32 %v174_v25 }
  0x43   : > { %v377_v29 = vpop.eup %376 }
  0x44   : > { %v379_v32 = vpop.eup %378  ;;  %v179_v33 = vmax.f32 %v377_v29, 0.0001 }
  0x45   : > { %v180_v34 = vmax.f32 %v379_v32, 0.0001 }
  0x46   : > { %v181_v35 = vmin.f32 %v179_v33, 0.9999 }
  0x47   : > { %v182_v36 = vmin.f32 %v180_v34, 0.9999 }
  0x49   : > { %v185_v38 = vcombine.low %v181_v35, %v182_v36 }
  0x4b   : > { %v192_v39 = vrot.slane %v185_v38, %v191_v37 }
  0x4d   : > { %v199_v40 = vrot.slane %v192_v39, %v191_v37 }
  0x4f   : > { %205 = vst.msk [vmem:[%s134_s27] sm:$0x3] %vm203_vm1, %v199_v40 }
  0x50   : > { %393 = shalt.err (!%p390_p5)
}
  0x51   : > { %s394_s15 = scalar_lea.hbm %s539_s3, 32  ;;  %s398_s21 = scalar_lea.hbm %s585_s1, 64 }
  0x52   : > { %p395_p6 = scmp.ne.s32.totalorder %s539_s3, %s394_s15  ;;  %p399_p10 = scmp.lt.u32.totalorder %s539_s3, %s585_s1 }
  0x53   : > { %p400_p11 = scmp.lt.u32.totalorder %s398_s21, %s394_s15  ;;  %p402_p13 = scmp.lt.u32.totalorder %s394_s15, %s539_s3 }
  0x54   : > { %p396_p7 = pnand %p395_p6, %p512_p4 }
  0x55   : > { %p401_p12 = por %p400_p11, %p399_p10 }
  0x56   : > { %p397_p9 = pneg %p396_p7 }
  0x57   : > { %p403_p0 = por %p402_p13, %p401_p12 }
  0x59   : > { %p404_p1 = pnand %p403_p0, %p397_p9 }
  0x5b   : > { %407 = shalt.err (!%p404_p1)
}
  0x5c   : > { %316 = dma.vmem_to_hbm [thread:$0]  (%p512_p4), %s534_s28, 32, %s539_s3, %s207_s4  }
  0x5d PF: > { %p322_p2 = scmp.ge.s32.totalorder %s458_s11, 2  ;;  %s235_s24 = sand.u32 1, %s438_s6  }
  0x5e   : > { %s236_s25 = scalar_lea.sflag [#allocation3], %s235_s24 }
  0x5f   : > { %p319_p3 = pnand %p322_p2, %p519_p8 }
  0x61   : > { %433 = dma.done.wait (!%p319_p3), %s236_s25, 32  }
  0x62   : > { %435 = vsyncadd (!%p319_p3), %s236_s25, 4294967264  ;;  %s14_s11 = sadd.s32 1, %s458_s11   ;;  %s588_s6 = smov %s442_s7 }
  0x63   : > { %p11_p5 = scmp.ge.s32.totalorder %s14_s11, 4   ;;  %s589_s7 = smov %s446_s8 }
  0x64   : > { %s590_s8 = smov %s525_s19  ;;  %s591_s9 = smov %s454_s10 }
  0x65   : > { %s592_s10 = smov %s594_s14  ;;  %13 = sbr.rel (!%p11_p5) target bundleno = 4 (0x4), region = 59 }
  0x6c   :  { %241 = vsyncpa [#allocation3], 1 }
  0x6d   :  { %243 = vsyncpa [#allocation3 + $0x1], 1 }

</bundles_post_ra>
